<compile_context>
chip_gen: v5e
topology: v5e:2x2
jax: 0.10.0
libtpu: 0.0.40
codegen_flags: <defaults>
</compile_context>

<pallas_src>
import functools

import jax
import jax.numpy as jnp
from jax.experimental import pallas as pl
from jax.experimental.pallas import tpu as pltpu


def _round_up(x, m):
    return ((x + m - 1) // m) * m


def _vmem_capacity_bytes():
    """Best-effort per-core VMEM capacity (v5e/v6e: 128 MiB, v7x: 64 MiB)."""
    try:
        info = pltpu.get_tpu_info()
        cap = getattr(info, "vmem_capacity_bytes", None)
        if cap:
            return int(cap)
    except Exception:
        pass
    return 64 * 1024 * 1024  # conservative default (v7x per-TensorCore VMEM)


def _vmem_limit_bytes(scratch_bytes):
    cap = _vmem_capacity_bytes()
    limit = max(32 * 1024 * 1024, scratch_bytes + 16 * 1024 * 1024)
    return int(min(limit, (cap * 5) // 8))


def _choose_neg_tile(n, d, itemsize):
    """Rows per negative tile; double-buffered scratch = 2*tn*d*itemsize."""
    cap = _vmem_capacity_bytes()
    scratch_budget = (12 if cap <= 64 * 1024 * 1024 else 24) * 1024 * 1024
    max_rows = max(8, scratch_budget // (2 * d * itemsize))
    tile_cap = min(512, max_rows)
    if n <= tile_cap:
        return n
    return max(128, (tile_cap // 128) * 128)


def _pick_chunk(d):
    """Lane-chunk for the reduction (bounds f32 temporaries for large D)."""
    if d <= 512:
        return d
    for c in (512, 256, 128):
        if d % c == 0:
            return c
    return d


def _unroll_factor(n):
    for u in (8, 4, 2):
        if n % u == 0:
            return u
    return 1


# ---------------------------------------------------------------------------
# head-batch / tail-batch kernel: fused entity gather + coefficient dot
# ---------------------------------------------------------------------------
def _neg_score_kernel(ids_ref,          # SMEM (B, n_pad) int32 (scalar prefetch)
                      coef_ref,         # (1, 1, D) fused coefficient row
                      ent_hbm,          # ANY (E, D) entity table in HBM
                      out_ref,          # (1, tn, 1)
                      gbuf, sem,        # scratch: (2, tn, D) gather buf + 2 DMA sems
                      *, tn, d, chunk):
    b = pl.program_id(0)
    nt = pl.program_id(1)
    n_tiles = pl.num_programs(1)
    slot = nt % 2

    def issue_tile(tile_idx, slot_idx):
        base = tile_idx * tn

        def body(j, carry):
            row = ids_ref[b, base + j]
            pltpu.make_async_copy(
                ent_hbm.at[pl.ds(row, 1), :],
                gbuf.at[slot_idx, pl.ds(j, 1), :],
                sem.at[slot_idx],
            ).start()
            return carry

        jax.lax.fori_loop(0, tn, body, 0, unroll=_unroll_factor(tn))

    # Prime the pipeline on the first tile of this batch row.
    @pl.when(nt == 0)
    def _prime():
        issue_tile(0, 0)

    # Prefetch the next tile of the SAME batch row into the other slot while
    # the VPU reduces the current one (batch axis stays 'parallel'; the
    # double-buffer chain never crosses a batch row).
    @pl.when(nt + 1 < n_tiles)
    def _prefetch_next():
        issue_tile(nt + 1, 1 - slot)

    # One bulk wait per tile: every row copy of this tile signalled sem[slot];
    # the accumulated byte count equals a single full (tn, d) transfer, so a
    # single wait descriptor of that size consumes it all.
    pltpu.make_async_copy(gbuf.at[1 - slot], gbuf.at[slot], sem.at[slot]).wait()

    coef = coef_ref[0].astype(jnp.float32)        # (1, d)
    gslot = gbuf.at[slot]                         # (tn, d) view
    acc = jnp.zeros((tn, 1), dtype=jnp.float32)
    for c0 in range(0, d, chunk):                 # chunked lane reduction
        c1 = min(c0 + chunk, d)
        g = gslot[:, c0:c1].astype(jnp.float32)
        acc = acc + jnp.sum(g * coef[:, c0:c1], axis=1, keepdims=True)

    out_ref[...] = acc[None]                      # (1, tn, 1)


def complex_neg_score(neg_ids, coef, entity_table, *, tile_rows=None):
    """Scores for negative-sample modes.

    neg_ids:      (B, N) int entity ids (the negatives).
    coef:         (B, D) fused (relation x fixed-entity) coefficient, f32.
    entity_table: (E, D) entity embedding table (gathered in-kernel from HBM).
    """
    B, N = neg_ids.shape
    _, D = entity_table.shape
    itemsize = entity_table.dtype.itemsize
    tn = int(tile_rows) if tile_rows is not None else _choose_neg_tile(N, D, itemsize)
    n_pad = _round_up(N, tn)
    n_tiles = n_pad // tn

    ids = neg_ids.astype(jnp.int32)
    if n_pad != N:
        # Pad with id 0 (a valid row); padded scores are sliced off below.
        ids = jnp.pad(ids, ((0, 0), (0, n_pad - N)))
    coef3 = coef.astype(jnp.float32)[:, None, :]          # (B, 1, D)
    scratch_bytes = 2 * tn * D * itemsize

    kernel = functools.partial(_neg_score_kernel, tn=tn, d=D, chunk=_pick_chunk(D))
    out = pl.pallas_call(
        kernel,
        out_shape=jax.ShapeDtypeStruct((B, n_pad, 1), jnp.float32),
        grid_spec=pltpu.PrefetchScalarGridSpec(
            num_scalar_prefetch=1,
            grid=(B, n_tiles),
            in_specs=[
                pl.BlockSpec((1, 1, D), lambda b, nt, ids_ref: (b, 0, 0)),
                pl.BlockSpec(memory_space=pl.ANY),
            ],
            out_specs=pl.BlockSpec((1, tn, 1), lambda b, nt, ids_ref: (b, nt, 0)),
            scratch_shapes=[
                pltpu.VMEM((2, tn, D), entity_table.dtype),
                pltpu.SemaphoreType.DMA((2,)),
            ],
        ),
        compiler_params=pltpu.CompilerParams(
            dimension_semantics=("parallel", "arbitrary"),
            vmem_limit_bytes=_vmem_limit_bytes(scratch_bytes),
        ),
    )(ids, coef3, entity_table)
    return out[:, :N, 0]


# ---------------------------------------------------------------------------
# 'single' mode kernel: per-row dot of gathered tails and coefficient rows
# ---------------------------------------------------------------------------
def _single_score_kernel(t_ref, c_ref, out_ref, *, d, chunk):
    tb = t_ref.shape[0]
    acc = jnp.zeros((tb, 1), dtype=jnp.float32)
    for c0 in range(0, d, chunk):
        c1 = min(c0 + chunk, d)
        acc = acc + jnp.sum(
            t_ref[:, c0:c1].astype(jnp.float32) * c_ref[:, c0:c1].astype(jnp.float32),
            axis=1, keepdims=True)
    out_ref[...] = acc


def complex_single_score(tail_rows, coef):
    B, D = tail_rows.shape
    tb = min(256, _round_up(B, 8))
    b_pad = _round_up(B, tb)
    t = tail_rows
    c = coef.astype(jnp.float32)
    if b_pad != B:
        t = jnp.pad(t, ((0, b_pad - B), (0, 0)))
        c = jnp.pad(c, ((0, b_pad - B), (0, 0)))
    out = pl.pallas_call(
        functools.partial(_single_score_kernel, d=D, chunk=_pick_chunk(D)),
        out_shape=jax.ShapeDtypeStruct((b_pad, 1), jnp.float32),
        grid=(b_pad // tb,),
        in_specs=[pl.BlockSpec((tb, D), lambda i: (i, 0)),
                  pl.BlockSpec((tb, D), lambda i: (i, 0))],
        out_specs=pl.BlockSpec((tb, 1), lambda i: (i, 0)),
        compiler_params=pltpu.CompilerParams(
            dimension_semantics=("parallel",),
            vmem_limit_bytes=_vmem_limit_bytes(4 * tb * D * t.dtype.itemsize),
        ),
    )(t, c)
    return out[:B]


# ---------------------------------------------------------------------------
# Model wrapper (mirrors the PyTorch KGEModel forward)
# ---------------------------------------------------------------------------
class KGEModelPallas:
    """JAX/Pallas port of the PyTorch KGEModel (ComplEx scoring)."""

    def __init__(self, nentity, nrelation, hidden_dim, gamma, key,
                 embedding_dtype=jnp.float32):
        if hidden_dim % 2:
            raise ValueError("ComplEx's hidden dim should be divided by 2")
        self.nentity = nentity
        self.nrelation = nrelation
        self.hidden_dim = hidden_dim
        self.half_dim = hidden_dim // 2
        self.epsilon = 2.0
        self.gamma = jnp.asarray([gamma], dtype=jnp.float32)
        self.embedding_range = jnp.asarray(
            [(float(gamma) + self.epsilon) / hidden_dim], dtype=jnp.float32)
        rng = float(self.embedding_range[0])
        k1, k2 = jax.random.split(key)
        self.entity_embedding = jax.random.uniform(
            k1, (nentity, hidden_dim), dtype=jnp.float32, minval=-rng, maxval=rng)
        self.relation_embedding = jax.random.uniform(
            k2, (nrelation, hidden_dim), dtype=jnp.float32, minval=-rng, maxval=rng)
        # Gather-path tables.  bfloat16 halves the dominant HBM gather traffic
        # (the kernel always accumulates in f32); the float32 default keeps
        # exact numerical parity with the PyTorch reference module.
        self.entity_table = self.entity_embedding.astype(embedding_dtype)
        self.relation_table = self.relation_embedding.astype(embedding_dtype)

    # Coefficient multiplying the TAIL rows (also the 'single' mode formula).
    def _coef_tail_side(self, h, r):
        half = self.half_dim
        h_re, h_im = h[:, :half], h[:, half:]
        r_re, r_im = r[:, :half], r[:, half:]
        return jnp.concatenate(
            [h_re * r_re - h_im * r_im, h_re * r_im + h_im * r_re], axis=1)

    # Coefficient multiplying the HEAD rows (head-batch formula).
    def _coef_head_side(self, r, t):
        half = self.half_dim
        r_re, r_im = r[:, :half], r[:, half:]
        t_re, t_im = t[:, :half], t[:, half:]
        return jnp.concatenate(
            [r_re * t_re + r_im * t_im, r_re * t_im - r_im * t_re], axis=1)

    def forward(self, sample, mode='single', *, tile_rows=None):
        ent = self.entity_table
        rel = self.relation_table
        if mode == 'single':
            h = ent[sample[:, 0]].astype(jnp.float32)
            r = rel[sample[:, 1]].astype(jnp.float32)
            t = ent[sample[:, 2]]
            return complex_single_score(t, self._coef_tail_side(h, r))
        elif mode == 'head-batch':
            tail_part, head_part = sample
            r = rel[tail_part[:, 1]].astype(jnp.float32)
            t = ent[tail_part[:, 2]].astype(jnp.float32)      # fixed tail
            return complex_neg_score(head_part, self._coef_head_side(r, t), ent,
                                     tile_rows=tile_rows)
        elif mode == 'tail-batch':
            head_part, tail_part = sample
            h = ent[head_part[:, 0]].astype(jnp.float32)      # fixed head
            r = rel[head_part[:, 1]].astype(jnp.float32)
            return complex_neg_score(tail_part, self._coef_tail_side(h, r), ent,
                                     tile_rows=tile_rows)
        else:
            raise ValueError('mode %s not supported' % mode)


# ---------------------------------------------------------------------------
# Reference + self-test
# ---------------------------------------------------------------------------
def _reference_score(head, relation, tail, mode):
    half = head.shape[2] // 2
    re_h, im_h = head[..., :half], head[..., half:]
    re_r, im_r = relation[..., :half], relation[..., half:]
    re_t, im_t = tail[..., :half], tail[..., half:]
    if mode == 'head-batch':
        re_s = re_r * re_t + im_r * im_t
        im_s = re_r * im_t - im_r * re_t
        score = re_h * re_s + im_h * im_s
    else:
        re_s = re_h * re_r - im_h * im_r
        im_s = re_h * im_r + im_h * re_r
        score = re_s * re_t + im_s * im_t
    return score.sum(axis=2)


if __name__ == "__main__":
    key = jax.random.PRNGKey(0)
    k_model, k_pos, k_neg, k_neg_big = jax.random.split(key, 4)

    nentity, nrelation, hidden_dim, gamma = 50, 10, 32, 12.0
    batch, neg, neg_big = 2, 8, 320

    model = KGEModelPallas(nentity, nrelation, hidden_dim, gamma, k_model)

    heads = jax.random.randint(k_pos, (batch, 1), 0, nentity)
    rels = jax.random.randint(jax.random.fold_in(k_pos, 1), (batch, 1), 0, nrelation)
    tails = jax.random.randint(jax.random.fold_in(k_pos, 2), (batch, 1), 0, nentity)
    pos = jnp.concatenate([heads, rels, tails], axis=1).astype(jnp.int32)
    neg_ents = jax.random.randint(k_neg, (batch, neg), 0, nentity).astype(jnp.int32)
    neg_ents_big = jax.random.randint(
        k_neg_big, (batch, neg_big), 0, nentity).astype(jnp.int32)

    ent = model.entity_embedding
    rel = model.relation_embedding
    h = ent[pos[:, 0]][:, None, :]
    r = rel[pos[:, 1]][:, None, :]
    t = ent[pos[:, 2]][:, None, :]
    negs = ent[neg_ents.reshape(-1)].reshape(batch, neg, -1)
    negs_big = ent[neg_ents_big.reshape(-1)].reshape(batch, neg_big, -1)

    ok = True

    s_single = jax.block_until_ready(model.forward(pos, mode='single'))
    ok &= bool(jnp.allclose(s_single, _reference_score(h, r, t, 'single'), atol=1e-5))

    s_hb = jax.block_until_ready(model.forward((pos, neg_ents), mode='head-batch'))
    ok &= bool(jnp.allclose(s_hb, _reference_score(negs, r, t, 'head-batch'), atol=1e-5))

    s_tb = jax.block_until_ready(model.forward((pos, neg_ents), mode='tail-batch'))
    ok &= bool(jnp.allclose(s_tb, _reference_score(h, r, negs, 'tail-batch'), atol=1e-5))

    # Multi-tile runs: force several neg tiles per batch row so the
    # cross-tile double-buffered gather (prime / prefetch / bulk-wait) and the
    # id-0 padding paths are actually exercised on hardware.
    s_hb_big = jax.block_until_ready(
        model.forward((pos, neg_ents_big), mode='head-batch', tile_rows=128))
    ok &= bool(jnp.allclose(
        s_hb_big, _reference_score(negs_big, r, t, 'head-batch'), atol=1e-5))
    s_tb_big = jax.block_until_ready(
        model.forward((pos, neg_ents_big), mode='tail-batch', tile_rows=128))
    ok &= bool(jnp.allclose(
        s_tb_big, _reference_score(h, r, negs_big, 'tail-batch'), atol=1e-5))

    assert s_single.shape == (batch, 1)
    assert s_hb.shape == (batch, neg)
    assert s_tb.shape == (batch, neg)
    assert s_hb_big.shape == (batch, neg_big)
    assert s_tb_big.shape == (batch, neg_big)
    assert ok, "mismatch vs reference"
    print("KERNEL_OK")
</pallas_src>

<mosaic_0001>
module attributes {stable_mosaic.version = 11 : i64} {
  func.func @_single_score_kernel(%arg0: i32, %arg1: memref<8x32xf32, #tpu.memory_space<vmem>>, %arg2: memref<8x32xf32, #tpu.memory_space<vmem>>, %arg3: memref<8x1xf32, #tpu.memory_space<vmem>>) attributes {dimension_semantics = [#tpu.dimension_semantics<parallel>], iteration_bounds = array<i64: 1>, scalar_prefetch = 0 : i64, scratch_operands = 0 : i64, tpu.core_type = #tpu.core_type<tc>, window_params = [{transform_indices = @transform_0, window_bounds = array<i64: 8, 32>}, {transform_indices = @transform_1, window_bounds = array<i64: 8, 32>}, {transform_indices = @transform_2, window_bounds = array<i64: 8, 1>}]} {
    %cst = arith.constant 0.000000e+00 : f32
    %0 = vector.broadcast %cst : f32 to vector<8x1xf32>
    %c0 = arith.constant 0 : index
    %c0_0 = arith.constant 0 : index
    %1 = vector.load %arg1[%c0, %c0_0] : memref<8x32xf32, #tpu.memory_space<vmem>>, vector<8x32xf32>
    %c0_1 = arith.constant 0 : index
    %c0_2 = arith.constant 0 : index
    %2 = vector.load %arg2[%c0_1, %c0_2] : memref<8x32xf32, #tpu.memory_space<vmem>>, vector<8x32xf32>
    %3 = arith.mulf %1, %2 : vector<8x32xf32>
    %cst_3 = arith.constant dense<0.000000e+00> : vector<8xf32>
    %4 = vector.multi_reduction <add>, %3, %cst_3 [1] : vector<8x32xf32> to vector<8xf32>
    %5 = vector.shape_cast %4 : vector<8xf32> to vector<8x1xf32>
    %6 = arith.addf %0, %5 : vector<8x1xf32>
    %c0_4 = arith.constant 0 : index
    %c0_5 = arith.constant 0 : index
    %7 = vector.load %arg3[%c0_4, %c0_5] : memref<8x1xf32, #tpu.memory_space<vmem>>, vector<8x1xf32>
    tpu.vector_store %arg3[%c0_4, %c0_5], %6 {strides = array<i32>} : memref<8x1xf32, #tpu.memory_space<vmem>>, vector<8x1xf32>,
    return
  }
  func.func @transform_0(%arg0: i32) -> (i32, i32) {
    %c0_i32 = arith.constant 0 : i32
    %c0_i32_0 = arith.constant 0 : i32
    return %arg0, %c0_i32 : i32, i32
  }
  func.func @transform_1(%arg0: i32) -> (i32, i32) {
    %c0_i32 = arith.constant 0 : i32
    %c0_i32_0 = arith.constant 0 : i32
    return %arg0, %c0_i32 : i32, i32
  }
  func.func @transform_2(%arg0: i32) -> (i32, i32) {
    %c0_i32 = arith.constant 0 : i32
    %c0_i32_0 = arith.constant 0 : i32
    return %arg0, %c0_i32 : i32, i32
  }
}

</mosaic_0001>

<bundles_post_ra>
// kernel: tpu_custom_call.1
= control target key start
LH: loop header
LB: loop body
LE: loop exit
PB: predicated region body
PF: predicated region fallthrough
CT: control target
= control target key end

     0   :  { %7 = vsyncpa [#allocation3], 0  ;;  %s135_s0 = inlined_call_operand.hbm [shape: f32[8,32], index: 0, kind: input, shape index: {}]   ;;  %s136_s1 = inlined_call_operand.hbm [shape: f32[8,32], index: 1, kind: input, shape index: {}]   ;;  %s137_s2 = inlined_call_operand.vmem [shape: f32[8,1], index: 2, kind: output, shape index: {}]  }
   0x1   :  { %s14_s11 = sshll.u32 %s135_s0, 4  ;;  %s15_s11 = int_to_ptr.hbm [resolvable:$true] %s14_s11 }
   0x2   :  { %8 = vsyncpa [#allocation5], 0  ;;  %s109_s12 = smov [#allocation2]   ;;  %s25_s16 = sshll.u32 %s136_s1, 4  ;;  %s26_s16 = int_to_ptr.hbm [resolvable:$true] %s25_s16 }
   0x3   :  { %s16_s13 = sshll.u32 %s109_s12, 4  ;;  %s110_s17 = smov [#allocation4]   ;;  %s17_s13 = int_to_ptr.vmem [resolvable:$true] %s16_s13 }
   0x4   :  { %19 = dma.hbm_to_vmem [thread:$0]  %s15_s11, 128, %s17_s13, [#allocation3]  }
   0x5   :  { %s27_s18 = sshll.u32 %s110_s17, 4  ;;  %s28_s18 = int_to_ptr.vmem [resolvable:$true] %s27_s18 }
   0x6   :  { %30 = dma.hbm_to_vmem [thread:$0]  %s26_s16, 128, %s28_s18, [#allocation5]  }
   0x7   :  { %105 = dma.done.wait [#allocation3], 128  }
   0x8   :  { %106 = vsyncadd [#allocation3], 4294967168 }
   0x9   :  { %107 = dma.done.wait [#allocation5], 128  }
   0xa   :  { %108 = vsyncadd [#allocation5], 4294967168  ;;  %v39_v0 = vld [vmem:[#allocation2] sm:$0xff]  ;;  %v40_v1 = vld [vmem:[#allocation4] sm:$0xff]  ;;  %vm42_vm0 = vcmask 261120   ;;  %vm47_vm1 = vcmask 7168  }
   0xb   :  { %v41_v2 = vmul.f32 %v40_v1, %v39_v0 }
   0xd   :  { %v43_v3 = vsel %vm42_vm0, %v41_v2, 0.0 }
   0xe   :  { %44 = vadd.xlane.f32.xlu0 %v43_v3 }
  0x81   :  { %v45_v4 = vpop.xlane.xlu0 %44 }
  0x82   :  { %48 = vst.msk [vmem:[%s137_s2] sm:$0xff] %vm47_vm1, %v45_v4 }
  0x83   :  { %53 = vsyncpa [#allocation3], 1 }
  0x84   :  { %54 = vsyncpa [#allocation5], 1 }

</bundles_post_ra>
